<compile_context>
chip_gen: v6e
topology: v6e:2x2x1
jax: 0.10.0
libtpu: 0.0.40
codegen_flags: <defaults>
</compile_context>

<pallas_src>
import functools

import jax
import jax.numpy as jnp
from jax.experimental import pallas as pl
from jax.experimental.pallas import tpu as pltpu

_LANE = 128


def _round_up(x, m):
    return ((x + m - 1) // m) * m


def _pad_last2(a, rows, cols, dtype):
    """Zero-pad the last two dims of `a` to (rows, cols) and cast."""
    pads = [(0, 0)] * (a.ndim - 2) + [(0, rows - a.shape[-2]),
                                      (0, cols - a.shape[-1])]
    return jnp.pad(a.astype(dtype), pads)


# ------------------------------------------------------------------ kernel ---
def _rgcn_layer_kernel(a_ref, xk_ref, xi_ref, w_ref, root_ref, bias_ref,
                       out_ref, *, apply_relu):
    """Grid = (dst_tiles [parallel], relations [arbitrary], src_tiles [arbitrary]).

    a_ref   : (TM, TK)  bf16   relation-r adjacency tile (dst rows, src cols)
    xk_ref  : (TK, Dp)  bf16   X rows for the src/K tile  (aggregation operand)
    xi_ref  : (TM, Dp)  bf16   X rows for the dst tile    (root/self-loop)
    w_ref   : (Dp, Dp)  bf16   relation transform
    root_ref: (Dp, Dp)  bf16   self-loop transform
    bias_ref: (1, Dp)   f32
    out_ref : (TM, Dp)  f32    resident accumulator for this dst tile
    """
    r = pl.program_id(1)
    k = pl.program_id(2)

    @pl.when((r == 0) & (k == 0))
    def _init():
        # self-loop (root) transform + bias, once per output tile.
        out_ref[...] = (
            jnp.dot(xi_ref[...], root_ref[...],
                    preferred_element_type=jnp.float32)
            + bias_ref[...]
        )

    # mean aggregation over relation-r edges for this (dst, src) tile pair.
    h = jnp.dot(a_ref[...], xk_ref[...], preferred_element_type=jnp.float32)
    # relation transform; contraction dim is the lane-dense padded width (128).
    out_ref[...] += jnp.dot(h.astype(jnp.bfloat16), w_ref[...],
                            preferred_element_type=jnp.float32)

    if apply_relu:
        @pl.when((r == pl.num_programs(1) - 1)
                 & (k == pl.num_programs(2) - 1))
        def _relu():
            out_ref[...] = jnp.maximum(out_ref[...], 0.0)


def rgcn_layer(adj_p, x_p, w_p, root_p, bias_p, *, tm, tk, apply_relu):
    """adj_p: (R, Np, Np) bf16, x_p: (Np, Dp) bf16, w_p: (R, Dp, Dp) bf16,
    root_p: (Dp, Dp) bf16, bias_p: (1, Dp) f32.  Returns (Np, Dp) f32."""
    R, Np, _ = adj_p.shape
    Dp = x_p.shape[1]
    grid = (Np // tm, R, Np // tk)
    kernel = functools.partial(_rgcn_layer_kernel, apply_relu=apply_relu)
    # TODO(synk): for large sparse graphs, replace the dense A_r stream with
    # scalar-prefetched block-sparse tiles (skip all-zero adjacency tiles).
    return pl.pallas_call(
        kernel,
        out_shape=jax.ShapeDtypeStruct((Np, Dp), jnp.float32),
        grid_spec=pltpu.PrefetchScalarGridSpec(
            num_scalar_prefetch=0,
            grid=grid,
            in_specs=[
                # A_r tile for (dst i, src k); dominant HBM traffic, bf16.
                pl.BlockSpec((pl.Squeezed(), tm, tk),
                             lambda i, r, k: (r, i, k)),
                # X rows for the src/K tile.
                pl.BlockSpec((tk, Dp), lambda i, r, k: (k, 0)),
                # X rows for the dst tile (root operand).
                pl.BlockSpec((tm, Dp), lambda i, r, k: (i, 0)),
                # W_r (dense is free at MXU granularity since Dp <= 128).
                pl.BlockSpec((pl.Squeezed(), Dp, Dp),
                             lambda i, r, k: (r, 0, 0)),
                pl.BlockSpec((Dp, Dp), lambda i, r, k: (0, 0)),   # root
                pl.BlockSpec((1, Dp), lambda i, r, k: (0, 0)),    # bias
            ],
            out_specs=pl.BlockSpec((tm, Dp), lambda i, r, k: (i, 0)),
        ),
        compiler_params=pltpu.CompilerParams(
            dimension_semantics=("parallel", "arbitrary", "arbitrary")),
    )(adj_p, x_p, x_p, w_p, root_p, bias_p)


# ------------------------------------------------------------------- glue ----
def build_norm_adjacency(edge_index, edge_type, num_nodes, num_relations):
    """Dense per-relation adjacency with row (target) mean-normalization."""
    src, dst = edge_index[0], edge_index[1]
    adj = jnp.zeros((num_relations, num_nodes, num_nodes), jnp.float32)
    adj = adj.at[edge_type, dst, src].add(1.0)
    deg = adj.sum(axis=-1, keepdims=True)                 # in-degree per relation
    adj = jnp.where(deg > 0, adj / jnp.maximum(deg, 1.0), 0.0)
    return adj


def blocks_to_full(w_blocks):
    """(R, B, db, db) block-diagonal parts -> dense (R, D, D).
    TODO(synk): for emb_dim > 128 keep W block-diagonal in the kernel
    (batched 'mbd,bde->mbe') instead of densifying."""
    R, B, db, _ = w_blocks.shape

    def one(blk):  # blk: (B, db, db)
        return jax.scipy.linalg.block_diag(*[blk[b] for b in range(B)])

    return jax.vmap(one)(w_blocks)


def init_params(key, num_nodes, num_relations, num_layers, emb_dim, num_blocks):
    assert emb_dim % num_blocks == 0, "num_blocks must divide emb_dim"
    db = emb_dim // num_blocks
    keys = jax.random.split(key, 1 + 3 * num_layers)
    params = {
        "embed": jax.random.normal(keys[0], (num_nodes, emb_dim), jnp.float32) * 0.1,
        "layers": [],
    }
    for l in range(num_layers):
        kw, kr, kb = keys[1 + 3 * l: 4 + 3 * l]
        w_blocks = jax.random.normal(kw, (num_relations, num_blocks, db, db),
                                     jnp.float32) * 0.1
        root = jax.random.normal(kr, (emb_dim, emb_dim), jnp.float32) * 0.1
        bias = jax.random.normal(kb, (1, emb_dim), jnp.float32) * 0.01
        params["layers"].append(
            {"w_full": blocks_to_full(w_blocks), "root": root, "bias": bias})
    return params


def _tile_for(n_pad):
    # 512x512 bf16 A tiles (double buffered) stay far under the scoped-VMEM
    # default on every generation (incl. v7x 64 MiB physical) while being big
    # enough to amortize the ~0.35 us per-grid-step overhead.
    return n_pad if n_pad <= 512 else 512


def rgcn_encoder_forward(params, node_ids, edge_index, edge_type,
                         num_nodes, num_relations):
    x = params["embed"][node_ids]                         # (N, D) embedding lookup
    N, D = x.shape
    adj = build_norm_adjacency(edge_index, edge_type, num_nodes, num_relations)

    # lane-dense padding: feature dim -> multiple of 128; node dim -> tile mult.
    Dp = _round_up(D, _LANE)
    Np = _round_up(N, _LANE)
    if Np > 512:
        Np = _round_up(Np, 512)
    tm = tk = _tile_for(Np)

    adj_p = _pad_last2(adj, Np, Np, jnp.bfloat16)         # (R, Np, Np)
    x_p = _pad_last2(x, Np, Dp, jnp.bfloat16)             # (Np, Dp)

    n_layers = len(params["layers"])
    out_p = None
    for i, lyr in enumerate(params["layers"]):
        w_p = _pad_last2(lyr["w_full"], Dp, Dp, jnp.bfloat16)
        root_p = _pad_last2(lyr["root"], Dp, Dp, jnp.bfloat16)
        bias_p = _pad_last2(lyr["bias"], 1, Dp, jnp.float32)
        apply_relu = i < n_layers - 1                     # ReLU between layers only
        # TODO(synk): dropout omitted (p=0 / eval mode -> identity).
        out_p = rgcn_layer(adj_p, x_p, w_p, root_p, bias_p,
                           tm=tm, tk=tk, apply_relu=apply_relu)
        x_p = out_p.astype(jnp.bfloat16)                  # bf16 feed for next layer
    return out_p[:N, :D]                                  # strip padding, f32


def rgcn_encoder_reference(params, node_ids, edge_index, edge_type,
                           num_nodes, num_relations):
    """Pure-JAX f32 reference for validation."""
    x = params["embed"][node_ids]
    adj = build_norm_adjacency(edge_index, edge_type, num_nodes, num_relations)
    n_layers = len(params["layers"])
    for i, lyr in enumerate(params["layers"]):
        agg = jnp.einsum("rnm,md->rnd", adj, x)
        out = (jnp.einsum("rnd,rde->ne", agg, lyr["w_full"])
               + x @ lyr["root"] + lyr["bias"])
        if i < n_layers - 1:
            out = jnp.maximum(out, 0.0)
        x = out
    return x


# ------------------------------------------------------------------- main ----
if __name__ == "__main__":
    num_nodes = 64
    num_relations = 3
    num_layers = 2
    emb_dim = 32
    num_blocks = 4        # must divide emb_dim (RGCNConv block decomposition)
    num_edges = 128

    key = jax.random.PRNGKey(0)
    k_param, k_src, k_dst, k_type = jax.random.split(key, 4)

    params = init_params(k_param, num_nodes, num_relations, num_layers,
                         emb_dim, num_blocks)

    node_ids = jnp.arange(num_nodes, dtype=jnp.int32)
    src = jax.random.randint(k_src, (num_edges,), 0, num_nodes, jnp.int32)
    dst = jax.random.randint(k_dst, (num_edges,), 0, num_nodes, jnp.int32)
    edge_index = jnp.stack([src, dst], axis=0)            # (2, E): row0=src, row1=dst
    edge_type = jax.random.randint(k_type, (num_edges,), 0, num_relations, jnp.int32)

    fwd = jax.jit(functools.partial(rgcn_encoder_forward,
                                    num_nodes=num_nodes,
                                    num_relations=num_relations))
    out = jax.block_until_ready(fwd(params, node_ids, edge_index, edge_type))

    ref = rgcn_encoder_reference(params, node_ids, edge_index, edge_type,
                                 num_nodes, num_relations)
    rel_err = float(jnp.max(jnp.abs(out - ref)) / (jnp.max(jnp.abs(ref)) + 1e-6))

    assert out.shape == (num_nodes, emb_dim) and out.dtype == jnp.float32
    assert rel_err < 5e-2, f"bf16 kernel deviates from f32 reference: {rel_err}"
    print("KERNEL_OK")
</pallas_src>

<mosaic_0001>
module attributes {stable_mosaic.version = 11 : i64} {
  func.func private @main(%arg0: i32) attributes {dimension_semantics = [#tpu.dimension_semantics<core_parallel>], iteration_bounds = array<i64: 2>, tpu.core_type = #tpu.core_type<sc_scalar_subcore>, window_params = []} {
    return
  }
}

module attributes {stable_mosaic.version = 11 : i64} {
  func.func private @main(%arg0: i32) attributes {dimension_semantics = [#tpu.dimension_semantics<core_parallel>], iteration_bounds = array<i64: 2>, tpu.core_type = #tpu.core_type<sc_scalar_subcore>, window_params = []} {
    return
  }
}

module attributes {stable_mosaic.version = 11 : i64} {
  func.func @_rgcn_layer_kernel(%arg0: i32, %arg1: i32, %arg2: i32, %arg3: memref<1x128x128xbf16, #tpu.memory_space<vmem>>, %arg4: memref<128x128xbf16, #tpu.memory_space<vmem>>, %arg5: memref<128x128xbf16, #tpu.memory_space<vmem>>, %arg6: memref<1x128x128xbf16, #tpu.memory_space<vmem>>, %arg7: memref<128x128xbf16, #tpu.memory_space<vmem>>, %arg8: memref<1x128xf32, #tpu.memory_space<vmem>>, %arg9: memref<128x128xf32, #tpu.memory_space<vmem>>) attributes {dimension_semantics = [#tpu.dimension_semantics<parallel>, #tpu.dimension_semantics<arbitrary>, #tpu.dimension_semantics<arbitrary>], iteration_bounds = array<i64: 1, 3, 1>, scalar_prefetch = 0 : i64, scratch_operands = 0 : i64, tpu.core_type = #tpu.core_type<tc>, window_params = [{transform_indices = @transform_0, window_bounds = array<i64: 1, 128, 128>}, {transform_indices = @transform_1, window_bounds = array<i64: 128, 128>}, {transform_indices = @transform_2, window_bounds = array<i64: 128, 128>}, {transform_indices = @transform_3, window_bounds = array<i64: 1, 128, 128>}, {pipeline_mode = #tpu.pipeline_mode<synchronous>, transform_indices = @transform_4, window_bounds = array<i64: 128, 128>}, {pipeline_mode = #tpu.pipeline_mode<synchronous>, transform_indices = @transform_5, window_bounds = array<i64: 1, 128>}, {transform_indices = @transform_6, window_bounds = array<i64: 128, 128>}]} {
    %c0_i32 = arith.constant 0 : i32
    %0 = arith.cmpi eq, %arg1, %c0_i32 : i32
    %c0_i32_0 = arith.constant 0 : i32
    %1 = arith.cmpi eq, %arg2, %c0_i32_0 : i32
    %2 = arith.andi %0, %1 : i1
    %3 = arith.extui %2 : i1 to i32
    %c0_i32_1 = arith.constant 0 : i32
    %4 = arith.cmpi ne, %3, %c0_i32_1 : i32
    scf.if %4 {
      %c0_16 = arith.constant 0 : index
      %c0_17 = arith.constant 0 : index
      %21 = vector.load %arg5[%c0_16, %c0_17] : memref<128x128xbf16, #tpu.memory_space<vmem>>, vector<128x128xbf16>
      %c0_18 = arith.constant 0 : index
      %c0_19 = arith.constant 0 : index
      %22 = vector.load %arg7[%c0_18, %c0_19] : memref<128x128xbf16, #tpu.memory_space<vmem>>, vector<128x128xbf16>
      %cst_20 = arith.constant dense<0.000000e+00> : vector<128x128xf32>
      %23 = tpu.matmul %21, %22, %cst_20 {dimension_numbers = #tpu.dot_dimension_numbers<[1], [0], [0], [1], [0, 0, 1, 1], [], []>} : vector<128x128xbf16>, vector<128x128xbf16>, vector<128x128xf32> -> vector<128x128xf32>
      %c0_21 = arith.constant 0 : index
      %c0_22 = arith.constant 0 : index
      %24 = vector.load %arg8[%c0_21, %c0_22] : memref<1x128xf32, #tpu.memory_space<vmem>>, vector<1x128xf32>
      %25 = vector.broadcast %24 : vector<1x128xf32> to vector<128x128xf32>
      %26 = arith.addf %23, %25 : vector<128x128xf32>
      %c0_23 = arith.constant 0 : index
      %c0_24 = arith.constant 0 : index
      %27 = vector.load %arg9[%c0_23, %c0_24] : memref<128x128xf32, #tpu.memory_space<vmem>>, vector<128x128xf32>
      tpu.vector_store %arg9[%c0_23, %c0_24], %26 {strides = array<i32>} : memref<128x128xf32, #tpu.memory_space<vmem>>, vector<128x128xf32>,
    } else {
    }
    %c0 = arith.constant 0 : index
    %c0_2 = arith.constant 0 : index
    %c0_3 = arith.constant 0 : index
    %5 = vector.load %arg3[%c0, %c0_2, %c0_3] : memref<1x128x128xbf16, #tpu.memory_space<vmem>>, vector<1x128x128xbf16>
    %6 = vector.shape_cast %5 : vector<1x128x128xbf16> to vector<128x128xbf16>
    %c0_4 = arith.constant 0 : index
    %c0_5 = arith.constant 0 : index
    %7 = vector.load %arg4[%c0_4, %c0_5] : memref<128x128xbf16, #tpu.memory_space<vmem>>, vector<128x128xbf16>
    %cst = arith.constant dense<0.000000e+00> : vector<128x128xf32>
    %8 = tpu.matmul %6, %7, %cst {dimension_numbers = #tpu.dot_dimension_numbers<[1], [0], [0], [1], [0, 0, 1, 1], [], []>} : vector<128x128xbf16>, vector<128x128xbf16>, vector<128x128xf32> -> vector<128x128xf32>
    %c0_6 = arith.constant 0 : index
    %c0_7 = arith.constant 0 : index
    %9 = vector.load %arg9[%c0_6, %c0_7] : memref<128x128xf32, #tpu.memory_space<vmem>>, vector<128x128xf32>
    %10 = arith.truncf %8 : vector<128x128xf32> to vector<128x128xbf16>
    %c0_8 = arith.constant 0 : index
    %c0_9 = arith.constant 0 : index
    %c0_10 = arith.constant 0 : index
    %11 = vector.load %arg6[%c0_8, %c0_9, %c0_10] : memref<1x128x128xbf16, #tpu.memory_space<vmem>>, vector<1x128x128xbf16>
    %12 = vector.shape_cast %11 : vector<1x128x128xbf16> to vector<128x128xbf16>
    %cst_11 = arith.constant dense<0.000000e+00> : vector<128x128xf32>
    %13 = tpu.matmul %10, %12, %cst_11 {dimension_numbers = #tpu.dot_dimension_numbers<[1], [0], [0], [1], [0, 0, 1, 1], [], []>} : vector<128x128xbf16>, vector<128x128xbf16>, vector<128x128xf32> -> vector<128x128xf32>
    %14 = arith.addf %9, %13 : vector<128x128xf32>
    %c0_12 = arith.constant 0 : index
    %c0_13 = arith.constant 0 : index
    %15 = vector.load %arg9[%c0_12, %c0_13] : memref<128x128xf32, #tpu.memory_space<vmem>>, vector<128x128xf32>
    tpu.vector_store %arg9[%c0_12, %c0_13], %14 {strides = array<i32>} : memref<128x128xf32, #tpu.memory_space<vmem>>, vector<128x128xf32>,
    %c2_i32 = arith.constant 2 : i32
    %16 = arith.cmpi eq, %arg1, %c2_i32 : i32
    %c0_i32_14 = arith.constant 0 : i32
    %17 = arith.cmpi eq, %arg2, %c0_i32_14 : i32
    %18 = arith.andi %16, %17 : i1
    %19 = arith.extui %18 : i1 to i32
    %c0_i32_15 = arith.constant 0 : i32
    %20 = arith.cmpi ne, %19, %c0_i32_15 : i32
    scf.if %20 {
      %c0_16 = arith.constant 0 : index
      %c0_17 = arith.constant 0 : index
      %21 = vector.load %arg9[%c0_16, %c0_17] : memref<128x128xf32, #tpu.memory_space<vmem>>, vector<128x128xf32>
      %cst_18 = arith.constant 0.000000e+00 : f32
      %22 = vector.broadcast %cst_18 : f32 to vector<128x128xf32>
      %23 = arith.maximumf %21, %22 : vector<128x128xf32>
      %c0_19 = arith.constant 0 : index
      %c0_20 = arith.constant 0 : index
      %24 = vector.load %arg9[%c0_19, %c0_20] : memref<128x128xf32, #tpu.memory_space<vmem>>, vector<128x128xf32>
      tpu.vector_store %arg9[%c0_19, %c0_20], %23 {strides = array<i32>} : memref<128x128xf32, #tpu.memory_space<vmem>>, vector<128x128xf32>,
    } else {
    }
    return
  }
  func.func @transform_0(%arg0: i32, %arg1: i32, %arg2: i32) -> (i32, i32, i32) {
    %c0_i32 = arith.constant 0 : i32
    return %arg1, %arg0, %arg2 : i32, i32, i32
  }
  func.func @transform_1(%arg0: i32, %arg1: i32, %arg2: i32) -> (i32, i32) {
    %c0_i32 = arith.constant 0 : i32
    %c0_i32_0 = arith.constant 0 : i32
    return %arg2, %c0_i32 : i32, i32
  }
  func.func @transform_2(%arg0: i32, %arg1: i32, %arg2: i32) -> (i32, i32) {
    %c0_i32 = arith.constant 0 : i32
    %c0_i32_0 = arith.constant 0 : i32
    return %arg0, %c0_i32 : i32, i32
  }
  func.func @transform_3(%arg0: i32, %arg1: i32, %arg2: i32) -> (i32, i32, i32) {
    %c0_i32 = arith.constant 0 : i32
    %c0_i32_0 = arith.constant 0 : i32
    %c0_i32_1 = arith.constant 0 : i32
    return %arg1, %c0_i32, %c0_i32_0 : i32, i32, i32
  }
  func.func @transform_4(%arg0: i32, %arg1: i32, %arg2: i32) -> (i32, i32) {
    %c0_i32 = arith.constant 0 : i32
    %c0_i32_0 = arith.constant 0 : i32
    %c0_i32_1 = arith.constant 0 : i32
    return %c0_i32, %c0_i32_0 : i32, i32
  }
  func.func @transform_5(%arg0: i32, %arg1: i32, %arg2: i32) -> (i32, i32) {
    %c0_i32 = arith.constant 0 : i32
    %c0_i32_0 = arith.constant 0 : i32
    %c0_i32_1 = arith.constant 0 : i32
    return %c0_i32, %c0_i32_0 : i32, i32
  }
  func.func @transform_6(%arg0: i32, %arg1: i32, %arg2: i32) -> (i32, i32) {
    %c0_i32 = arith.constant 0 : i32
    %c0_i32_0 = arith.constant 0 : i32
    return %arg0, %c0_i32 : i32, i32
  }
}

module attributes {stable_mosaic.version = 11 : i64} {
  func.func @_rgcn_layer_kernel(%arg0: i32, %arg1: i32, %arg2: i32, %arg3: memref<1x128x128xbf16, #tpu.memory_space<vmem>>, %arg4: memref<128x128xbf16, #tpu.memory_space<vmem>>, %arg5: memref<128x128xbf16, #tpu.memory_space<vmem>>, %arg6: memref<1x128x128xbf16, #tpu.memory_space<vmem>>, %arg7: memref<128x128xbf16, #tpu.memory_space<vmem>>, %arg8: memref<1x128xf32, #tpu.memory_space<vmem>>, %arg9: memref<128x128xf32, #tpu.memory_space<vmem>>) attributes {dimension_semantics = [#tpu.dimension_semantics<parallel>, #tpu.dimension_semantics<arbitrary>, #tpu.dimension_semantics<arbitrary>], iteration_bounds = array<i64: 1, 3, 1>, scalar_prefetch = 0 : i64, scratch_operands = 0 : i64, tpu.core_type = #tpu.core_type<tc>, window_params = [{transform_indices = @transform_0, window_bounds = array<i64: 1, 128, 128>}, {transform_indices = @transform_1, window_bounds = array<i64: 128, 128>}, {transform_indices = @transform_2, window_bounds = array<i64: 128, 128>}, {transform_indices = @transform_3, window_bounds = array<i64: 1, 128, 128>}, {pipeline_mode = #tpu.pipeline_mode<synchronous>, transform_indices = @transform_4, window_bounds = array<i64: 128, 128>}, {pipeline_mode = #tpu.pipeline_mode<synchronous>, transform_indices = @transform_5, window_bounds = array<i64: 1, 128>}, {transform_indices = @transform_6, window_bounds = array<i64: 128, 128>}]} {
    %c0_i32 = arith.constant 0 : i32
    %0 = arith.cmpi eq, %arg1, %c0_i32 : i32
    %c0_i32_0 = arith.constant 0 : i32
    %1 = arith.cmpi eq, %arg2, %c0_i32_0 : i32
    %2 = arith.andi %0, %1 : i1
    %3 = arith.extui %2 : i1 to i32
    %c0_i32_1 = arith.constant 0 : i32
    %4 = arith.cmpi ne, %3, %c0_i32_1 : i32
    scf.if %4 {
      %c0_14 = arith.constant 0 : index
      %c0_15 = arith.constant 0 : index
      %16 = vector.load %arg5[%c0_14, %c0_15] : memref<128x128xbf16, #tpu.memory_space<vmem>>, vector<128x128xbf16>
      %c0_16 = arith.constant 0 : index
      %c0_17 = arith.constant 0 : index
      %17 = vector.load %arg7[%c0_16, %c0_17] : memref<128x128xbf16, #tpu.memory_space<vmem>>, vector<128x128xbf16>
      %cst_18 = arith.constant dense<0.000000e+00> : vector<128x128xf32>
      %18 = tpu.matmul %16, %17, %cst_18 {dimension_numbers = #tpu.dot_dimension_numbers<[1], [0], [0], [1], [0, 0, 1, 1], [], []>} : vector<128x128xbf16>, vector<128x128xbf16>, vector<128x128xf32> -> vector<128x128xf32>
      %c0_19 = arith.constant 0 : index
      %c0_20 = arith.constant 0 : index
      %19 = vector.load %arg8[%c0_19, %c0_20] : memref<1x128xf32, #tpu.memory_space<vmem>>, vector<1x128xf32>
      %20 = vector.broadcast %19 : vector<1x128xf32> to vector<128x128xf32>
      %21 = arith.addf %18, %20 : vector<128x128xf32>
      %c0_21 = arith.constant 0 : index
      %c0_22 = arith.constant 0 : index
      %22 = vector.load %arg9[%c0_21, %c0_22] : memref<128x128xf32, #tpu.memory_space<vmem>>, vector<128x128xf32>
      tpu.vector_store %arg9[%c0_21, %c0_22], %21 {strides = array<i32>} : memref<128x128xf32, #tpu.memory_space<vmem>>, vector<128x128xf32>,
    } else {
    }
    %c0 = arith.constant 0 : index
    %c0_2 = arith.constant 0 : index
    %c0_3 = arith.constant 0 : index
    %5 = vector.load %arg3[%c0, %c0_2, %c0_3] : memref<1x128x128xbf16, #tpu.memory_space<vmem>>, vector<1x128x128xbf16>
    %6 = vector.shape_cast %5 : vector<1x128x128xbf16> to vector<128x128xbf16>
    %c0_4 = arith.constant 0 : index
    %c0_5 = arith.constant 0 : index
    %7 = vector.load %arg4[%c0_4, %c0_5] : memref<128x128xbf16, #tpu.memory_space<vmem>>, vector<128x128xbf16>
    %cst = arith.constant dense<0.000000e+00> : vector<128x128xf32>
    %8 = tpu.matmul %6, %7, %cst {dimension_numbers = #tpu.dot_dimension_numbers<[1], [0], [0], [1], [0, 0, 1, 1], [], []>} : vector<128x128xbf16>, vector<128x128xbf16>, vector<128x128xf32> -> vector<128x128xf32>
    %c0_6 = arith.constant 0 : index
    %c0_7 = arith.constant 0 : index
    %9 = vector.load %arg9[%c0_6, %c0_7] : memref<128x128xf32, #tpu.memory_space<vmem>>, vector<128x128xf32>
    %10 = arith.truncf %8 : vector<128x128xf32> to vector<128x128xbf16>
    %c0_8 = arith.constant 0 : index
    %c0_9 = arith.constant 0 : index
    %c0_10 = arith.constant 0 : index
    %11 = vector.load %arg6[%c0_8, %c0_9, %c0_10] : memref<1x128x128xbf16, #tpu.memory_space<vmem>>, vector<1x128x128xbf16>
    %12 = vector.shape_cast %11 : vector<1x128x128xbf16> to vector<128x128xbf16>
    %cst_11 = arith.constant dense<0.000000e+00> : vector<128x128xf32>
    %13 = tpu.matmul %10, %12, %cst_11 {dimension_numbers = #tpu.dot_dimension_numbers<[1], [0], [0], [1], [0, 0, 1, 1], [], []>} : vector<128x128xbf16>, vector<128x128xbf16>, vector<128x128xf32> -> vector<128x128xf32>
    %14 = arith.addf %9, %13 : vector<128x128xf32>
    %c0_12 = arith.constant 0 : index
    %c0_13 = arith.constant 0 : index
    %15 = vector.load %arg9[%c0_12, %c0_13] : memref<128x128xf32, #tpu.memory_space<vmem>>, vector<128x128xf32>
    tpu.vector_store %arg9[%c0_12, %c0_13], %14 {strides = array<i32>} : memref<128x128xf32, #tpu.memory_space<vmem>>, vector<128x128xf32>,
    return
  }
  func.func @transform_0(%arg0: i32, %arg1: i32, %arg2: i32) -> (i32, i32, i32) {
    %c0_i32 = arith.constant 0 : i32
    return %arg1, %arg0, %arg2 : i32, i32, i32
  }
  func.func @transform_1(%arg0: i32, %arg1: i32, %arg2: i32) -> (i32, i32) {
    %c0_i32 = arith.constant 0 : i32
    %c0_i32_0 = arith.constant 0 : i32
    return %arg2, %c0_i32 : i32, i32
  }
  func.func @transform_2(%arg0: i32, %arg1: i32, %arg2: i32) -> (i32, i32) {
    %c0_i32 = arith.constant 0 : i32
    %c0_i32_0 = arith.constant 0 : i32
    return %arg0, %c0_i32 : i32, i32
  }
  func.func @transform_3(%arg0: i32, %arg1: i32, %arg2: i32) -> (i32, i32, i32) {
    %c0_i32 = arith.constant 0 : i32
    %c0_i32_0 = arith.constant 0 : i32
    %c0_i32_1 = arith.constant 0 : i32
    return %arg1, %c0_i32, %c0_i32_0 : i32, i32, i32
  }
  func.func @transform_4(%arg0: i32, %arg1: i32, %arg2: i32) -> (i32, i32) {
    %c0_i32 = arith.constant 0 : i32
    %c0_i32_0 = arith.constant 0 : i32
    %c0_i32_1 = arith.constant 0 : i32
    return %c0_i32, %c0_i32_0 : i32, i32
  }
  func.func @transform_5(%arg0: i32, %arg1: i32, %arg2: i32) -> (i32, i32) {
    %c0_i32 = arith.constant 0 : i32
    %c0_i32_0 = arith.constant 0 : i32
    %c0_i32_1 = arith.constant 0 : i32
    return %c0_i32, %c0_i32_0 : i32, i32
  }
  func.func @transform_6(%arg0: i32, %arg1: i32, %arg2: i32) -> (i32, i32) {
    %c0_i32 = arith.constant 0 : i32
    %c0_i32_0 = arith.constant 0 : i32
    return %arg0, %c0_i32 : i32, i32
  }
}

</mosaic_0001>

<bundles_post_ra>
// kernel: rgcn_encoder_forward.3
= control target key start
LH: loop header
LB: loop body
LE: loop exit
PB: predicated region body
PF: predicated region fallthrough
CT: control target
= control target key end

     0   :  { %s1518_s21 = smov 0   ;;  %s1520_s22 = smov 0   ;;  %s1790_s0 = inlined_call_operand.vmem [shape: bf16[3,128,128], index: 0, kind: input, shape index: {}]   ;;  %s1791_s1 = inlined_call_operand.vmem [shape: bf16[128,128], index: 1, kind: input, shape index: {}, may-alias: {1,2}]   ;;  %s1792_s2 = inlined_call_operand.vmem [shape: bf16[128,128], index: 2, kind: input, shape index: {}, may-alias: {1,2}]   ;;  %s1793_s3 = inlined_call_operand.vmem [shape: bf16[3,128,128], index: 3, kind: input, shape index: {}]   ;;  %s1794_s4 = inlined_call_operand.vmem [shape: bf16[128,128], index: 4, kind: input, shape index: {}]   ;;  %s1795_s5 = inlined_call_operand.vmem [shape: f32[1,128], index: 5, kind: input, shape index: {}]   ;;  %s1796_s6 = inlined_call_operand.vmem [shape: f32[128,128], index: 6, kind: output, shape index: {}]  }
   0x1   :  { %s1522_s23 = smov 0  }
   0x2 LB: > { %s31_s24 = sadd.s32 1, %s1477_s22  ;;  %p1181_p0 = scmp.ge.s32.totalorder %s1481_s23, 1  ;;  %s1481_s23 = sphi %s1522_s23, %s16_s23   ;;  %s1477_s22 = sphi %s1520_s22, %s1798_s22   ;;  %s1473_s21 = sphi %s1518_s21, %s1797_s21  }
   0x3   : > { %p33_p1 = scmp.ge.s32.totalorder %s31_s24, 3  ;;  %p275_p2 = scmp.lt.s32.totalorder %s1481_s23, 4 }
   0x5   : > { %s1800_s24 = smov (%p33_p1, %s31_s24), 0  ;;  %p276_p3 = pnand %p1181_p0, %p275_p2 }
   0x6   : > { %p328_p4 = scmp.lt.s32.totalorder (!%p276_p3), %s1473_s21, 2  ;;  %p364_p5 = scmp.eq.s32.totalorder (!%p276_p3), %s1473_s21, 0 }
   0x7   : > { %279 = sbr.rel (%p276_p3) target bundleno = 716 (0x2cc), region = 44 }
   0xc   : > { %s1802_s21 = smov (!%p328_p4, %s1473_s21), 2  ;;  %369 = sbr.rel (!%p364_p5) target bundleno = 255 (0xff), region = 48  ;;  %v1419_v0 = vld [vmem:[%s1794_s4 + $0x38] sm:$0xff] (%p364_p5)   ;;  %v1420_v1 = vld [vmem:[%s1794_s4 + $0x30] sm:$0xff] (%p364_p5)   ;;  %v1421_v2 = vld [vmem:[%s1794_s4 + $0x28] sm:$0xff] (%p364_p5)  }
   0xd   : > { %s1232_s25 = sshll.u32 %s1802_s21, 6  ;;  %1283 = vmatprep.subr.bf16.mxu0 (%p364_p5), %v1419_v0  ;;  %1379 = vmatprep.subr.bf16.mxu1 (%p364_p5), %v1419_v0  ;;  %v1422_v3 = vld [vmem:[%s1794_s4 + $0x20] sm:$0xff] (%p364_p5)   ;;  %v1423_v6 = vld [vmem:[%s1794_s4 + $0x18] sm:$0xff] (%p364_p5)   ;;  %v1424_v7 = vld [vmem:[%s1794_s4 + $0x10] sm:$0xff] (%p364_p5)  }
   0xe   : > { %s1539_s28 = scalar_lea.vmem %s1790_s0, %s1232_s25  ;;  %s1544_s7 = scalar_lea.vmem %s1793_s3, %s1232_s25  ;;  %1284 = vmatpush3.bf16.msra.mxu0 (%p364_p5), %v1419_v0  ;;  %1387 = vmatpush3.bf16.msra.mxu1 (%p364_p5), %v1419_v0  ;;  %v1427_v4 = vld [vmem:[%s1792_s2] sm:$0xff] (%p364_p5)   ;;  %v1425_v8 = vld [vmem:[%s1794_s4 + $0x8] sm:$0xff] (%p364_p5)   ;;  %v1431_v12 = vld [vmem:[%s1792_s2 + $0x10] sm:$0xff] (%p364_p5)  }
   0xf   : > { %1285 = vmatprep.subr.bf16.mxu0 (%p364_p5), %v1420_v1  ;;  %1380 = vmatprep.subr.bf16.mxu1 (%p364_p5), %v1420_v1  ;;  %v1428_v5 = vld [vmem:[%s1792_s2 + $0x20] sm:$0xff] (%p364_p5)   ;;  %v1429_v10 = vld [vmem:[%s1792_s2 + $0x8] sm:$0xff] (%p364_p5)   ;;  %v1432_v13 = vld [vmem:[%s1792_s2 + $0x30] sm:$0xff] (%p364_p5)  }
  0x10   : > { %1299 = vmatprep.mubr.bf16.mxu0 (%p364_p5), %v1427_v4  ;;  %1307 = vmatprep.mubr.bf16.mxu1 (%p364_p5), %v1428_v5  ;;  %v1426_v9 = vld [vmem:[%s1794_s4] sm:$0xff] (%p364_p5)   ;;  %v1430_v11 = vld [vmem:[%s1792_s2 + $0x28] sm:$0xff] (%p364_p5)   ;;  %v1433_v14 = vld [vmem:[%s1792_s2 + $0x18] sm:$0xff] (%p364_p5)  }
  0x11   : > { %v1434_v15 = vld [vmem:[%s1792_s2 + $0x38] sm:$0xff]   ;;  %v1187_v16 = vld [vmem:[%s1795_s5] ss:$0 sm:$0xff] }
  0x12   : > { %1286 = vmatpush3.bf16.msra.mxu0 %v1420_v1  ;;  %1388 = vmatpush3.bf16.msra.mxu1 %v1420_v1 }
  0x13   : > { %1287 = vmatprep.subr.bf16.mxu0 %v1421_v2  ;;  %1381 = vmatprep.subr.bf16.mxu1 %v1421_v2 }
  0x16   : > { %1288 = vmatpush3.bf16.msra.mxu0 %v1421_v2  ;;  %1389 = vmatpush3.bf16.msra.mxu1 %v1421_v2 }
  0x17   : > { %1289 = vmatprep.subr.bf16.mxu0 %v1422_v3  ;;  %1382 = vmatprep.subr.bf16.mxu1 %v1422_v3 }
  0x1a   : > { %1290 = vmatpush3.bf16.msra.mxu0 %v1422_v3  ;;  %1390 = vmatpush3.bf16.msra.mxu1 %v1422_v3 }
  0x1b   : > { %1291 = vmatprep.subr.bf16.mxu0 %v1423_v6  ;;  %1383 = vmatprep.subr.bf16.mxu1 %v1423_v6 }
  0x1e   : > { %1292 = vmatpush3.bf16.msra.mxu0 %v1423_v6  ;;  %1391 = vmatpush3.bf16.msra.mxu1 %v1423_v6 }
  0x1f   : > { %1293 = vmatprep.subr.bf16.mxu0 %v1424_v7  ;;  %1384 = vmatprep.subr.bf16.mxu1 %v1424_v7 }
  0x22   : > { %1294 = vmatpush3.bf16.msra.mxu0 %v1424_v7  ;;  %1392 = vmatpush3.bf16.msra.mxu1 %v1424_v7 }
  0x23   : > { %1295 = vmatprep.subr.bf16.mxu0 %v1425_v8  ;;  %1385 = vmatprep.subr.bf16.mxu1 %v1425_v8 }
  0x26   : > { %1296 = vmatpush3.bf16.msra.mxu0 %v1425_v8  ;;  %1393 = vmatpush3.bf16.msra.mxu1 %v1425_v8 }
  0x27   : > { %1297 = vmatprep.subr.bf16.mxu0 %v1426_v9  ;;  %1386 = vmatprep.subr.bf16.mxu1 %v1426_v9 }
  0x2a   : > { %1298 = vmatpush3.bf16.msra.mxu0 %v1426_v9  ;;  %1394 = vmatpush3.bf16.msra.mxu1 %v1426_v9 }
  0x2d   : > { %1300 = vmatmul.mubr.bf16.vlgmr.msra.gmra.mxu0 %v1429_v10  ;;  %1308 = vmatmul.mubr.bf16.vlgmr.msra.gmra.mxu1 %v1430_v11 }
  0x2e   : > { %1303 = vmatprep.mubr.bf16.mxu0 %v1431_v12  ;;  %1311 = vmatprep.mubr.bf16.mxu1 %v1432_v13 }
  0x35   : > { %1304 = vmatmul.mubr.bf16.gmra.mxu0 %v1433_v14  ;;  %1312 = vmatmul.mubr.bf16.gmra.mxu1 %v1434_v15 }
  0xed   : > { %v1301_v17 = vpop.f32.mrf.mxu0  ;;  %v1309_v18 = vpop.f32.mrf.mxu1 }
  0xee   : > { %v548_v19 = vadd.f32 %v1301_v17, %v1187_v16  ;;  %v580_v20 = vadd.f32 %v1309_v18, %v1187_v16 }
  0xef   : > { %v539_v21 = vpop.f32.mrf.mxu0  ;;  %v571_v22 = vpop.f32.mrf.mxu1 }
  0xf0   : > { %604 = vst [vmem:[%s1796_s6 + $0x10] sm:$0xff] %v548_v19  ;;  %612 = vst [vmem:[%s1796_s6 + $0x50] sm:$0xff] %v580_v20  ;;  %v540_v23 = vadd.f32 %v1187_v16, %v539_v21  ;;  %v572_v24 = vadd.f32 %v1187_v16, %v571_v22 }
  0xf1   : > { %v1302_v25 = vpop.f32.mrf.mxu0  ;;  %v1310_v26 = vpop.f32.mrf.mxu1 }
  0xf2   : > { %602 = vst [vmem:[%s1796_s6] sm:$0xff] %v540_v23  ;;  %610 = vst [vmem:[%s1796_s6 + $0x40] sm:$0xff] %v572_v24  ;;  %v551_v27 = vadd.f32 %v1302_v25, %v1187_v16  ;;  %v583_v28 = vadd.f32 %v1310_v26, %v1187_v16 }
  0xf3   : > { %v542_v29 = vpop.f32.mrf.mxu0  ;;  %v574_v30 = vpop.f32.mrf.mxu1 }
  0xf4   : > { %605 = vst [vmem:[%s1796_s6 + $0x18] sm:$0xff] %v551_v27  ;;  %613 = vst [vmem:[%s1796_s6 + $0x58] sm:$0xff] %v583_v28  ;;  %v543_v31 = vadd.f32 %v1187_v16, %v542_v29  ;;  %v575_v32 = vadd.f32 %v1187_v16, %v574_v30 }
  0xf5   : > { %v1305_v33 = vpop.f32.mrf.mxu0  ;;  %v1313_v34 = vpop.f32.mrf.mxu1 }
  0xf6   : > { %603 = vst [vmem:[%s1796_s6 + $0x8] sm:$0xff] %v543_v31  ;;  %611 = vst [vmem:[%s1796_s6 + $0x48] sm:$0xff] %v575_v32  ;;  %v564_v35 = vadd.f32 %v1305_v33, %v1187_v16  ;;  %v596_v36 = vadd.f32 %v1313_v34, %v1187_v16 }
  0xf7   : > { %v555_v37 = vpop.f32.mrf.mxu0  ;;  %v587_v38 = vpop.f32.mrf.mxu1 }
  0xf8   : > { %608 = vst [vmem:[%s1796_s6 + $0x30] sm:$0xff] %v564_v35  ;;  %616 = vst [vmem:[%s1796_s6 + $0x70] sm:$0xff] %v596_v36  ;;  %v556_v39 = vadd.f32 %v1187_v16, %v555_v37  ;;  %v588_v40 = vadd.f32 %v1187_v16, %v587_v38 }
  0xf9   : > { %v1306_v41 = vpop.f32.mrf.mxu0  ;;  %v1314_v42 = vpop.f32.mrf.mxu1 }
  0xfa   : > { %606 = vst [vmem:[%s1796_s6 + $0x20] sm:$0xff] %v556_v39  ;;  %614 = vst [vmem:[%s1796_s6 + $0x60] sm:$0xff] %v588_v40  ;;  %v567_v43 = vadd.f32 %v1306_v41, %v1187_v16  ;;  %v599_v44 = vadd.f32 %v1314_v42, %v1187_v16 }
  0xfb   : > { %v558_v45 = vpop.f32.mrf.mxu0  ;;  %v590_v46 = vpop.f32.mrf.mxu1 }
  0xfc   : > { %609 = vst [vmem:[%s1796_s6 + $0x38] sm:$0xff] %v567_v43  ;;  %617 = vst [vmem:[%s1796_s6 + $0x78] sm:$0xff] %v599_v44  ;;  %v559_v47 = vadd.f32 %v1187_v16, %v558_v45  ;;  %v591_v48 = vadd.f32 %v1187_v16, %v590_v46 }
  0xfe   : > { %607 = vst [vmem:[%s1796_s6 + $0x28] sm:$0xff] %v559_v47  ;;  %615 = vst [vmem:[%s1796_s6 + $0x68] sm:$0xff] %v591_v48 }
  0xff PF: > { %v1435_v49 = vld [vmem:[%s1791_s1 + $0x38] sm:$0xff]   ;;  %v1436_v50 = vld [vmem:[%s1791_s1 + $0x30] sm:$0xff]   ;;  %v1437_v51 = vld [vmem:[%s1791_s1 + $0x28] sm:$0xff]  }
 0x100   : > { %1315 = vmatprep.subr.bf16.mxu0 %v1435_v49  ;;  %v1438_v52 = vld [vmem:[%s1791_s1 + $0x20] sm:$0xff]   ;;  %v1439_v54 = vld [vmem:[%s1791_s1 + $0x18] sm:$0xff]   ;;  %v1440_v55 = vld [vmem:[%s1791_s1 + $0x10] sm:$0xff]  }
 0x101   : > { %1316 = vmatpush3.bf16.msra.mxu0 %v1435_v49  ;;  %v1443_v53 = vld [vmem:[%s1539_s28] sm:$0xff]   ;;  %v1451_v56 = vld [vmem:[%s1544_s7 + $0x38] sm:$0xff]   ;;  %v1452_v57 = vld [vmem:[%s1544_s7 + $0x30] sm:$0xff]  }
 0x102   : > { %1317 = vmatprep.subr.bf16.mxu0 %v1436_v50  ;;  %1331 = vmatprep.mubr.bf16.mxu0 %v1443_v53  ;;  %v1441_v58 = vld [vmem:[%s1791_s1 + $0x8] sm:$0xff]   ;;  %v1442_v60 = vld [vmem:[%s1791_s1] sm:$0xff]   ;;  %v1455_v62 = vld [vmem:[%s1544_s7 + $0x18] sm:$0xff]  }
 0x103   : > { %1347 = vmatprep.subr.bf16.mxu1 %v1451_v56  ;;  %v1453_v59 = vld [vmem:[%s1544_s7 + $0x28] sm:$0xff]   ;;  %v1454_v61 = vld [vmem:[%s1544_s7 + $0x20] sm:$0xff]   ;;  %v1445_v0 = vld [vmem:[%s1539_s28 + $0x10] sm:$0xff]  }
 0x104   : > { %1348 = vmatpush3.bf16.msra.mxu1 %v1451_v56  ;;  %v1444_v63 = vld [vmem:[%s1539_s28 + $0x8] sm:$0xff]   ;;  %v1456_v1 = vld [vmem:[%s1544_s7 + $0x10] sm:$0xff]   ;;  %v1446_v2 = vld [vmem:[%s1539_s28 + $0x18] sm:$0xff]  }
 0x105   : > { %1318 = vmatpush3.bf16.msra.mxu0 %v1436_v50  ;;  %1349 = vmatprep.subr.bf16.mxu1 %v1452_v57  ;;  %v1447_v3 = vld [vmem:[%s1539_s28 + $0x20] sm:$0xff]   ;;  %v1448_v4 = vld [vmem:[%s1539_s28 + $0x28] sm:$0xff]   ;;  %v1449_v5 = vld [vmem:[%s1539_s28 + $0x30] sm:$0xff]  }
 0x106   : > { %1319 = vmatprep.subr.bf16.mxu0 %v1437_v51  ;;  %v1450_v6 = vld [vmem:[%s1539_s28 + $0x38] sm:$0xff]   ;;  %v1457_v7 = vld [vmem:[%s1544_s7 + $0x8] sm:$0xff]   ;;  %v1458_v8 = vld [vmem:[%s1544_s7] sm:$0xff]  }
 0x107   : > { %v845_v33 = vld [vmem:[%s1796_s6 + $0x10] sm:$0xff]  ;;  %v843_v35 = vld [vmem:[%s1796_s6] sm:$0xff]  ;;  %v846_v38 = vld [vmem:[%s1796_s6 + $0x18] sm:$0xff] }
 0x108   : > { %1350 = vmatpush3.bf16.msra.mxu1 %v1452_v57  ;;  %v844_v41 = vld [vmem:[%s1796_s6 + $0x8] sm:$0xff]  ;;  %v849_v44 = vld [vmem:[%s1796_s6 + $0x30] sm:$0xff]  ;;  %v847_v47 = vld [vmem:[%s1796_s6 + $0x20] sm:$0xff] }
 0x109   : > { %1320 = vmatpush3.bf16.msra.mxu0 %v1437_v51  ;;  %1351 = vmatprep.subr.bf16.mxu1 %v1453_v59  ;;  %v850_v50 = vld [vmem:[%s1796_s6 + $0x38] sm:$0xff]  ;;  %v848_v53 = vld [vmem:[%s1796_s6 + $0x28] sm:$0xff]  ;;  %v853_v56 = vld [vmem:[%s1796_s6 + $0x50] sm:$0xff] }
 0x10a   : > { %1321 = vmatprep.subr.bf16.mxu0 %v1438_v52 }
 0x10c   : > { %1352 = vmatpush3.bf16.msra.mxu1 %v1453_v59  ;;  %v851_v59 = vld [vmem:[%s1796_s6 + $0x40] sm:$0xff] }
 0x10d   : > { %1322 = vmatpush3.bf16.msra.mxu0 %v1438_v52  ;;  %1353 = vmatprep.subr.bf16.mxu1 %v1454_v61 }
 0x10e   : > { %1323 = vmatprep.subr.bf16.mxu0 %v1439_v54 }
 0x110   : > { %1354 = vmatpush3.bf16.msra.mxu1 %v1454_v61 }
 0x111   : > { %1324 = vmatpush3.bf16.msra.mxu0 %v1439_v54  ;;  %1355 = vmatprep.subr.bf16.mxu1 %v1455_v62 }
 0x112   : > { %1325 = vmatprep.subr.bf16.mxu0 %v1440_v55 }
 0x114   : > { %1356 = vmatpush3.bf16.msra.mxu1 %v1455_v62  ;;  %v854_v62 = vld [vmem:[%s1796_s6 + $0x58] sm:$0xff] }
 0x115   : > { %1326 = vmatpush3.bf16.msra.mxu0 %v1440_v55  ;;  %1357 = vmatprep.subr.bf16.mxu1 %v1456_v1 }
 0x116   : > { %1327 = vmatprep.subr.bf16.mxu0 %v1441_v58 }
 0x118   : > { %1358 = vmatpush3.bf16.msra.mxu1 %v1456_v1  ;;  %v852_v1 = vld [vmem:[%s1796_s6 + $0x48] sm:$0xff] }
 0x119   : > { %1328 = vmatpush3.bf16.msra.mxu0 %v1441_v58  ;;  %1359 = vmatprep.subr.bf16.mxu1 %v1457_v7 }
 0x11a   : > { %1329 = vmatprep.subr.bf16.mxu0 %v1442_v60 }
 0x11c   : > { %1360 = vmatpush3.bf16.msra.mxu1 %v1457_v7  ;;  %v855_v7 = vld [vmem:[%s1796_s6 + $0x60] sm:$0xff] }
 0x11d   : > { %1330 = vmatpush3.bf16.msra.mxu0 %v1442_v60  ;;  %1361 = vmatprep.subr.bf16.mxu1 %v1458_v8 }
 0x120   : > { %1332 = vmatmul.mubr.bf16.vlgmr.msra.gmra.mxu0 %v1444_v63  ;;  %1362 = vmatpush3.bf16.msra.mxu1 %v1458_v8 }
 0x121   : > { %1335 = vmatprep.mubr.bf16.mxu0 %v1445_v0 }
 0x128   : > { %1336 = vmatmul.mubr.bf16.gmra.mxu0 %v1446_v2 }
 0x129   : > { %1339 = vmatprep.mubr.bf16.mxu0 %v1447_v3 }
 0x130   : > { %1340 = vmatmul.mubr.bf16.gmra.mxu0 %v1448_v4  ;;  %v857_v4 = vld [vmem:[%s1796_s6 + $0x70] sm:$0xff] }
 0x131   : > { %1343 = vmatprep.mubr.bf16.mxu0 %v1449_v5 }
 0x138   : > { %1344 = vmatmul.mubr.bf16.gmra.mxu0 %v1450_v6 }
 0x1e0   : > { %v1333_v9 = vpop.f32.mrf.mxu0 }
 0x1e2   : > { %v780_v10 = vpop.f32.mrf.mxu0 }
 0x1e4   : > { %v1334_v11 = vpop.f32.mrf.mxu0 }
 0x1e5   : > { %v860_v14 = vpack.c.bf16 %v1334_v11, %v1333_v9 }
 0x1e6   : > { %v783_v12 = vpop.f32.mrf.mxu0 }
 0x1e7   : > { %v859_v13 = vpack.c.bf16 %v783_v12, %v780_v10  ;;  %v858_v10 = vld [vmem:[%s1796_s6 + $0x78] sm:$0xff] }
 0x1e8   : > { %v1337_v15 = vpop.f32.mrf.mxu0 }
 0x1e9   : > { %1363 = vmatprep.mubr.bf16.mxu1 %v859_v13  ;;  %v856_v13 = vld [vmem:[%s1796_s6 + $0x68] sm:$0xff] }
 0x1ea   : > { %v796_v16 = vpop.f32.mrf.mxu0  ;;  %1364 = vmatmul.mubr.bf16.vlgmr.msra.gmra.mxu1 %v860_v14 }
 0x1ec   : > { %v1338_v17 = vpop.f32.mrf.mxu0 }
 0x1ed   : > { %v862_v20 = vpack.c.bf16 %v1338_v17, %v1337_v15 }
 0x1ee   : > { %v799_v18 = vpop.f32.mrf.mxu0 }
 0x1ef   : > { %v861_v19 = vpack.c.bf16 %v799_v18, %v796_v16 }
 0x1f0   : > { %v1341_v21 = vpop.f32.mrf.mxu0 }
 0x1f1   : > { %1367 = vmatprep.mubr.bf16.mxu1 %v861_v19 }
 0x1f2   : > { %v812_v22 = vpop.f32.mrf.mxu0  ;;  %1368 = vmatmul.mubr.bf16.gmra.mxu1 %v862_v20 }
 0x1f4   : > { %v1342_v23 = vpop.f32.mrf.mxu0 }
 0x1f5   : > { %v864_v26 = vpack.c.bf16 %v1342_v23, %v1341_v21 }
 0x1f6   : > { %v815_v24 = vpop.f32.mrf.mxu0 }
 0x1f7   : > { %v863_v25 = vpack.c.bf16 %v815_v24, %v812_v22 }
 0x1f8   : > { %v1345_v27 = vpop.f32.mrf.mxu0 }
 0x1f9   : > { %1371 = vmatprep.mubr.bf16.mxu1 %v863_v25 }
 0x1fa   : > { %v828_v28 = vpop.f32.mrf.mxu0  ;;  %1372 = vmatmul.mubr.bf16.gmra.mxu1 %v864_v26 }
 0x1fc   : > { %v1346_v29 = vpop.f32.mrf.mxu0 }
 0x1fd   : > { %v866_v32 = vpack.c.bf16 %v1346_v29, %v1345_v27 }
 0x1fe   : > { %v831_v30 = vpop.f32.mrf.mxu0 }
 0x1ff   : > { %v865_v31 = vpack.c.bf16 %v831_v30, %v828_v28 }
 0x201   : > { %1375 = vmatprep.mubr.bf16.mxu1 %v865_v31 }
 0x202   : > { %1376 = vmatmul.mubr.bf16.gmra.mxu1 %v866_v32 }
 0x2aa   : > { %v1365_v34 = vpop.f32.mrf.mxu1 }
 0x2ab   : > { %v1030_v36 = vadd.f32 %v1365_v34, %v845_v33 }
 0x2ac   : > { %v965_v37 = vpop.f32.mrf.mxu1 }
 0x2ad   : > { %1046 = vst [vmem:[%s1796_s6 + $0x10] sm:$0xff] %v1030_v36  ;;  %v1028_v39 = vadd.f32 %v965_v37, %v843_v35 }
 0x2ae   : > { %v1366_v40 = vpop.f32.mrf.mxu1 }
 0x2af   : > { %1044 = vst [vmem:[%s1796_s6] sm:$0xff] %v1028_v39  ;;  %v1031_v42 = vadd.f32 %v1366_v40, %v846_v38 }
 0x2b0   : > { %v968_v43 = vpop.f32.mrf.mxu1 }
 0x2b1   : > { %1047 = vst [vmem:[%s1796_s6 + $0x18] sm:$0xff] %v1031_v42  ;;  %v1029_v45 = vadd.f32 %v968_v43, %v844_v41 }
 0x2b2   : > { %v1369_v46 = vpop.f32.mrf.mxu1 }
 0x2b3   : > { %1045 = vst [vmem:[%s1796_s6 + $0x8] sm:$0xff] %v1029_v45  ;;  %v1034_v48 = vadd.f32 %v1369_v46, %v849_v44 }
 0x2b4   : > { %v981_v49 = vpop.f32.mrf.mxu1 }
 0x2b5   : > { %1050 = vst [vmem:[%s1796_s6 + $0x30] sm:$0xff] %v1034_v48  ;;  %v1032_v51 = vadd.f32 %v981_v49, %v847_v47 }
 0x2b6   : > { %v1370_v52 = vpop.f32.mrf.mxu1 }
 0x2b7   : > { %1048 = vst [vmem:[%s1796_s6 + $0x20] sm:$0xff] %v1032_v51  ;;  %v1035_v54 = vadd.f32 %v1370_v52, %v850_v50 }
 0x2b8   : > { %v984_v55 = vpop.f32.mrf.mxu1 }
 0x2b9   : > { %1051 = vst [vmem:[%s1796_s6 + $0x38] sm:$0xff] %v1035_v54  ;;  %v1033_v57 = vadd.f32 %v984_v55, %v848_v53 }
 0x2ba   : > { %v1373_v58 = vpop.f32.mrf.mxu1 }
 0x2bb   : > { %1049 = vst [vmem:[%s1796_s6 + $0x28] sm:$0xff] %v1033_v57  ;;  %v1038_v60 = vadd.f32 %v1373_v58, %v853_v56 }
 0x2bc   : > { %v997_v61 = vpop.f32.mrf.mxu1 }
 0x2bd   : > { %1054 = vst [vmem:[%s1796_s6 + $0x50] sm:$0xff] %v1038_v60  ;;  %v1036_v63 = vadd.f32 %v997_v61, %v851_v59 }
 0x2be   : > { %v1374_v0 = vpop.f32.mrf.mxu1 }
 0x2bf   : > { %1052 = vst [vmem:[%s1796_s6 + $0x40] sm:$0xff] %v1036_v63  ;;  %v1039_v2 = vadd.f32 %v1374_v0, %v854_v62 }
 0x2c0   : > { %v1000_v3 = vpop.f32.mrf.mxu1 }
 0x2c1   : > { %1055 = vst [vmem:[%s1796_s6 + $0x58] sm:$0xff] %v1039_v2  ;;  %v1037_v5 = vadd.f32 %v1000_v3, %v852_v1 }
 0x2c2   : > { %v1377_v6 = vpop.f32.mrf.mxu1 }
 0x2c3   : > { %1053 = vst [vmem:[%s1796_s6 + $0x48] sm:$0xff] %v1037_v5  ;;  %v1042_v8 = vadd.f32 %v1377_v6, %v857_v4 }
 0x2c4   : > { %v1013_v9 = vpop.f32.mrf.mxu1 }
 0x2c5   : > { %1058 = vst [vmem:[%s1796_s6 + $0x70] sm:$0xff] %v1042_v8  ;;  %v1040_v11 = vadd.f32 %v1013_v9, %v855_v7 }
 0x2c6   : > { %v1378_v12 = vpop.f32.mrf.mxu1 }
 0x2c7   : > { %1056 = vst [vmem:[%s1796_s6 + $0x60] sm:$0xff] %v1040_v11  ;;  %v1043_v14 = vadd.f32 %v1378_v12, %v858_v10 }
 0x2c8   : > { %v1016_v15 = vpop.f32.mrf.mxu1 }
 0x2c9   : > { %1059 = vst [vmem:[%s1796_s6 + $0x78] sm:$0xff] %v1043_v14  ;;  %v1041_v16 = vadd.f32 %v1016_v15, %v856_v13 }
 0x2cb   : > { %1057 = vst [vmem:[%s1796_s6 + $0x68] sm:$0xff] %v1041_v16 }
 0x2cc PF: > { %s16_s23 = sadd.s32 1, %s1481_s23   ;;  %s1797_s21 = smov %s1477_s22 }
 0x2cd   : > { %p13_p6 = scmp.ge.s32.totalorder %s16_s23, 5   ;;  %s1798_s22 = smov %s1800_s24 }
 0x2cf   :  { %15 = sbr.rel (!%p13_p6) target bundleno = 2 (0x2), region = 87 }

// kernel: rgcn_encoder_forward.2
= control target key start
LH: loop header
LB: loop body
LE: loop exit
PB: predicated region body
PF: predicated region fallthrough
CT: control target
= control target key end

     0   :  { %s1573_s21 = smov 0   ;;  %s1575_s22 = smov 0   ;;  %s1949_s0 = inlined_call_operand.vmem [shape: bf16[3,128,128], index: 0, kind: input, shape index: {}]   ;;  %s1950_s1 = inlined_call_operand.vmem [shape: bf16[128,128], index: 1, kind: input, shape index: {}, may-alias: {1,2}]   ;;  %s1951_s2 = inlined_call_operand.vmem [shape: bf16[128,128], index: 2, kind: input, shape index: {}, may-alias: {1,2}]   ;;  %s1952_s3 = inlined_call_operand.vmem [shape: bf16[3,128,128], index: 3, kind: input, shape index: {}]   ;;  %s1953_s4 = inlined_call_operand.vmem [shape: bf16[128,128], index: 4, kind: input, shape index: {}]   ;;  %s1954_s5 = inlined_call_operand.vmem [shape: f32[1,128], index: 5, kind: input, shape index: {}]   ;;  %s1955_s6 = inlined_call_operand.vmem [shape: f32[128,128], index: 6, kind: output, shape index: {}]  }
   0x1   :  { %s1577_s23 = smov 0  }
   0x2 LB: > { %s31_s24 = sadd.s32 1, %s1532_s22  ;;  %p1234_p0 = scmp.ge.s32.totalorder %s1536_s23, 1  ;;  %s1536_s23 = sphi %s1577_s23, %s16_s23   ;;  %s1532_s22 = sphi %s1575_s22, %s1957_s22   ;;  %s1528_s21 = sphi %s1573_s21, %s1956_s21  }
   0x3   : > { %p33_p1 = scmp.ge.s32.totalorder %s31_s24, 3  ;;  %p275_p2 = scmp.lt.s32.totalorder %s1536_s23, 4 }
   0x5   : > { %s1959_s24 = smov (%p33_p1, %s31_s24), 0  ;;  %p276_p3 = pnand %p1234_p0, %p275_p2 }
   0x6   : > { %p328_p4 = scmp.lt.s32.totalorder (!%p276_p3), %s1528_s21, 2  ;;  %p364_p5 = scmp.eq.s32.totalorder (!%p276_p3), %s1528_s21, 0 }
   0x7   : > { %279 = sbr.rel (%p276_p3) target bundleno = 726 (0x2d6), region = 44 }
   0xc   : > { %s329_s25 = scalar_select %p328_p4, %s1528_s21, 2  ;;  %v1474_v0 = vld [vmem:[%s1953_s4 + $0x38] sm:$0xff] (%p364_p5)   ;;  %v1475_v1 = vld [vmem:[%s1953_s4 + $0x30] sm:$0xff] (%p364_p5)   ;;  %v1476_v2 = vld [vmem:[%s1953_s4 + $0x28] sm:$0xff] (%p364_p5)  }
   0xd   : > { %369 = sbr.rel (!%p364_p5) target bundleno = 255 (0xff), region = 48  ;;  %1338 = vmatprep.subr.bf16.mxu0 (%p364_p5), %v1474_v0  ;;  %1434 = vmatprep.subr.bf16.mxu1 (%p364_p5), %v1474_v0  ;;  %v1477_v3 = vld [vmem:[%s1953_s4 + $0x20] sm:$0xff] (%p364_p5)   ;;  %v1478_v6 = vld [vmem:[%s1953_s4 + $0x18] sm:$0xff] (%p364_p5)   ;;  %v1479_v7 = vld [vmem:[%s1953_s4 + $0x10] sm:$0xff] (%p364_p5)  }
   0xe   : > { %s1286_s26 = sshll.u32 %s329_s25, 6  ;;  %1339 = vmatpush3.bf16.msra.mxu0 (%p364_p5), %v1474_v0  ;;  %1442 = vmatpush3.bf16.msra.mxu1 (%p364_p5), %v1474_v0  ;;  %v1482_v4 = vld [vmem:[%s1951_s2] sm:$0xff] (%p364_p5)   ;;  %v1480_v8 = vld [vmem:[%s1953_s4 + $0x8] sm:$0xff] (%p364_p5)   ;;  %v1486_v12 = vld [vmem:[%s1951_s2 + $0x10] sm:$0xff] (%p364_p5)  }
   0xf   : > { %s1599_s29 = scalar_lea.vmem %s1949_s0, %s1286_s26  ;;  %s1604_s8 = scalar_lea.vmem %s1952_s3, %s1286_s26  ;;  %1340 = vmatprep.subr.bf16.mxu0 (%p364_p5), %v1475_v1  ;;  %1435 = vmatprep.subr.bf16.mxu1 (%p364_p5), %v1475_v1  ;;  %v1483_v5 = vld [vmem:[%s1951_s2 + $0x20] sm:$0xff] (%p364_p5)   ;;  %v1484_v10 = vld [vmem:[%s1951_s2 + $0x8] sm:$0xff] (%p364_p5)   ;;  %v1487_v13 = vld [vmem:[%s1951_s2 + $0x30] sm:$0xff] (%p364_p5)  }
  0x10   : > { %1354 = vmatprep.mubr.bf16.mxu0 (%p364_p5), %v1482_v4  ;;  %1362 = vmatprep.mubr.bf16.mxu1 (%p364_p5), %v1483_v5  ;;  %v1481_v9 = vld [vmem:[%s1953_s4] sm:$0xff] (%p364_p5)   ;;  %v1485_v11 = vld [vmem:[%s1951_s2 + $0x28] sm:$0xff] (%p364_p5)   ;;  %v1488_v14 = vld [vmem:[%s1951_s2 + $0x18] sm:$0xff] (%p364_p5)  }
  0x11   : > { %v1489_v15 = vld [vmem:[%s1951_s2 + $0x38] sm:$0xff] (%p364_p5)   ;;  %v1240_v16 = vld [vmem:[%s1954_s5] ss:$0 sm:$0xff] (%p364_p5) }
  0x12   : > { %1341 = vmatpush3.bf16.msra.mxu0 %v1475_v1  ;;  %1443 = vmatpush3.bf16.msra.mxu1 %v1475_v1 }
  0x13   : > { %1342 = vmatprep.subr.bf16.mxu0 %v1476_v2  ;;  %1436 = vmatprep.subr.bf16.mxu1 %v1476_v2 }
  0x16   : > { %1343 = vmatpush3.bf16.msra.mxu0 %v1476_v2  ;;  %1444 = vmatpush3.bf16.msra.mxu1 %v1476_v2 }
  0x17   : > { %1344 = vmatprep.subr.bf16.mxu0 %v1477_v3  ;;  %1437 = vmatprep.subr.bf16.mxu1 %v1477_v3 }
  0x1a   : > { %1345 = vmatpush3.bf16.msra.mxu0 %v1477_v3  ;;  %1445 = vmatpush3.bf16.msra.mxu1 %v1477_v3 }
  0x1b   : > { %1346 = vmatprep.subr.bf16.mxu0 %v1478_v6  ;;  %1438 = vmatprep.subr.bf16.mxu1 %v1478_v6 }
  0x1e   : > { %1347 = vmatpush3.bf16.msra.mxu0 %v1478_v6  ;;  %1446 = vmatpush3.bf16.msra.mxu1 %v1478_v6 }
  0x1f   : > { %1348 = vmatprep.subr.bf16.mxu0 %v1479_v7  ;;  %1439 = vmatprep.subr.bf16.mxu1 %v1479_v7 }
  0x22   : > { %1349 = vmatpush3.bf16.msra.mxu0 %v1479_v7  ;;  %1447 = vmatpush3.bf16.msra.mxu1 %v1479_v7 }
  0x23   : > { %1350 = vmatprep.subr.bf16.mxu0 %v1480_v8  ;;  %1440 = vmatprep.subr.bf16.mxu1 %v1480_v8 }
  0x26   : > { %1351 = vmatpush3.bf16.msra.mxu0 %v1480_v8  ;;  %1448 = vmatpush3.bf16.msra.mxu1 %v1480_v8 }
  0x27   : > { %1352 = vmatprep.subr.bf16.mxu0 %v1481_v9  ;;  %1441 = vmatprep.subr.bf16.mxu1 %v1481_v9 }
  0x2a   : > { %1353 = vmatpush3.bf16.msra.mxu0 %v1481_v9  ;;  %1449 = vmatpush3.bf16.msra.mxu1 %v1481_v9 }
  0x2d   : > { %1355 = vmatmul.mubr.bf16.vlgmr.msra.gmra.mxu0 %v1484_v10  ;;  %1363 = vmatmul.mubr.bf16.vlgmr.msra.gmra.mxu1 %v1485_v11 }
  0x2e   : > { %1358 = vmatprep.mubr.bf16.mxu0 %v1486_v12  ;;  %1366 = vmatprep.mubr.bf16.mxu1 %v1487_v13 }
  0x35   : > { %1359 = vmatmul.mubr.bf16.gmra.mxu0 %v1488_v14  ;;  %1367 = vmatmul.mubr.bf16.gmra.mxu1 %v1489_v15 }
  0xed   : > { %v1356_v17 = vpop.f32.mrf.mxu0  ;;  %v1364_v18 = vpop.f32.mrf.mxu1 }
  0xee   : > { %v548_v19 = vadd.f32 %v1356_v17, %v1240_v16  ;;  %v580_v20 = vadd.f32 %v1364_v18, %v1240_v16 }
  0xef   : > { %v539_v21 = vpop.f32.mrf.mxu0  ;;  %v571_v22 = vpop.f32.mrf.mxu1 }
  0xf0   : > { %604 = vst [vmem:[%s1955_s6 + $0x10] sm:$0xff] %v548_v19  ;;  %612 = vst [vmem:[%s1955_s6 + $0x50] sm:$0xff] %v580_v20  ;;  %v540_v23 = vadd.f32 %v1240_v16, %v539_v21  ;;  %v572_v24 = vadd.f32 %v1240_v16, %v571_v22 }
  0xf1   : > { %v1357_v25 = vpop.f32.mrf.mxu0  ;;  %v1365_v26 = vpop.f32.mrf.mxu1 }
  0xf2   : > { %602 = vst [vmem:[%s1955_s6] sm:$0xff] %v540_v23  ;;  %610 = vst [vmem:[%s1955_s6 + $0x40] sm:$0xff] %v572_v24  ;;  %v551_v27 = vadd.f32 %v1357_v25, %v1240_v16  ;;  %v583_v28 = vadd.f32 %v1365_v26, %v1240_v16 }
  0xf3   : > { %v542_v29 = vpop.f32.mrf.mxu0  ;;  %v574_v30 = vpop.f32.mrf.mxu1 }
  0xf4   : > { %605 = vst [vmem:[%s1955_s6 + $0x18] sm:$0xff] %v551_v27  ;;  %613 = vst [vmem:[%s1955_s6 + $0x58] sm:$0xff] %v583_v28  ;;  %v543_v31 = vadd.f32 %v1240_v16, %v542_v29  ;;  %v575_v32 = vadd.f32 %v1240_v16, %v574_v30 }
  0xf5   : > { %v1360_v33 = vpop.f32.mrf.mxu0  ;;  %v1368_v34 = vpop.f32.mrf.mxu1 }
  0xf6   : > { %603 = vst [vmem:[%s1955_s6 + $0x8] sm:$0xff] %v543_v31  ;;  %611 = vst [vmem:[%s1955_s6 + $0x48] sm:$0xff] %v575_v32  ;;  %v564_v35 = vadd.f32 %v1360_v33, %v1240_v16  ;;  %v596_v36 = vadd.f32 %v1368_v34, %v1240_v16 }
  0xf7   : > { %v555_v37 = vpop.f32.mrf.mxu0  ;;  %v587_v38 = vpop.f32.mrf.mxu1 }
  0xf8   : > { %608 = vst [vmem:[%s1955_s6 + $0x30] sm:$0xff] %v564_v35  ;;  %616 = vst [vmem:[%s1955_s6 + $0x70] sm:$0xff] %v596_v36  ;;  %v556_v39 = vadd.f32 %v1240_v16, %v555_v37  ;;  %v588_v40 = vadd.f32 %v1240_v16, %v587_v38 }
  0xf9   : > { %v1361_v41 = vpop.f32.mrf.mxu0  ;;  %v1369_v42 = vpop.f32.mrf.mxu1 }
  0xfa   : > { %606 = vst [vmem:[%s1955_s6 + $0x20] sm:$0xff] %v556_v39  ;;  %614 = vst [vmem:[%s1955_s6 + $0x60] sm:$0xff] %v588_v40  ;;  %v567_v43 = vadd.f32 %v1361_v41, %v1240_v16  ;;  %v599_v44 = vadd.f32 %v1369_v42, %v1240_v16 }
  0xfb   : > { %v558_v45 = vpop.f32.mrf.mxu0  ;;  %v590_v46 = vpop.f32.mrf.mxu1 }
  0xfc   : > { %609 = vst [vmem:[%s1955_s6 + $0x38] sm:$0xff] %v567_v43  ;;  %617 = vst [vmem:[%s1955_s6 + $0x78] sm:$0xff] %v599_v44  ;;  %v559_v47 = vadd.f32 %v1240_v16, %v558_v45  ;;  %v591_v48 = vadd.f32 %v1240_v16, %v590_v46 }
  0xfe   : > { %607 = vst [vmem:[%s1955_s6 + $0x28] sm:$0xff] %v559_v47  ;;  %615 = vst [vmem:[%s1955_s6 + $0x68] sm:$0xff] %v591_v48 }
  0xff PF: > { %v1490_v49 = vld [vmem:[%s1950_s1 + $0x38] sm:$0xff]   ;;  %v1491_v50 = vld [vmem:[%s1950_s1 + $0x30] sm:$0xff]   ;;  %v1492_v51 = vld [vmem:[%s1950_s1 + $0x28] sm:$0xff]   ;;  %p1060_p6 = scmp.eq.s32.totalorder %s1528_s21, 2 }
 0x100   : > { %1370 = vmatprep.subr.bf16.mxu0 %v1490_v49  ;;  %v1493_v52 = vld [vmem:[%s1950_s1 + $0x20] sm:$0xff]   ;;  %v1494_v54 = vld [vmem:[%s1950_s1 + $0x18] sm:$0xff]   ;;  %v1495_v55 = vld [vmem:[%s1950_s1 + $0x10] sm:$0xff]  }
 0x101   : > { %1371 = vmatpush3.bf16.msra.mxu0 %v1490_v49  ;;  %v1498_v53 = vld [vmem:[%s1599_s29] sm:$0xff]   ;;  %v1506_v56 = vld [vmem:[%s1604_s8 + $0x38] sm:$0xff]   ;;  %v1507_v57 = vld [vmem:[%s1604_s8 + $0x30] sm:$0xff]  }
 0x102   : > { %1372 = vmatprep.subr.bf16.mxu0 %v1491_v50  ;;  %1386 = vmatprep.mubr.bf16.mxu0 %v1498_v53  ;;  %v1496_v58 = vld [vmem:[%s1950_s1 + $0x8] sm:$0xff]   ;;  %v1497_v60 = vld [vmem:[%s1950_s1] sm:$0xff]   ;;  %v1510_v62 = vld [vmem:[%s1604_s8 + $0x18] sm:$0xff]  }
 0x103   : > { %1402 = vmatprep.subr.bf16.mxu1 %v1506_v56  ;;  %v1508_v59 = vld [vmem:[%s1604_s8 + $0x28] sm:$0xff]   ;;  %v1509_v61 = vld [vmem:[%s1604_s8 + $0x20] sm:$0xff]   ;;  %v1500_v0 = vld [vmem:[%s1599_s29 + $0x10] sm:$0xff]  }
 0x104   : > { %1403 = vmatpush3.bf16.msra.mxu1 %v1506_v56  ;;  %v1499_v63 = vld [vmem:[%s1599_s29 + $0x8] sm:$0xff]   ;;  %v1511_v1 = vld [vmem:[%s1604_s8 + $0x10] sm:$0xff]   ;;  %v1501_v2 = vld [vmem:[%s1599_s29 + $0x18] sm:$0xff]  }
 0x105   : > { %1373 = vmatpush3.bf16.msra.mxu0 %v1491_v50  ;;  %1404 = vmatprep.subr.bf16.mxu1 %v1507_v57  ;;  %v1502_v3 = vld [vmem:[%s1599_s29 + $0x20] sm:$0xff]   ;;  %v1503_v4 = vld [vmem:[%s1599_s29 + $0x28] sm:$0xff]   ;;  %v1504_v5 = vld [vmem:[%s1599_s29 + $0x30] sm:$0xff]  }
 0x106   : > { %1374 = vmatprep.subr.bf16.mxu0 %v1492_v51  ;;  %v1505_v6 = vld [vmem:[%s1599_s29 + $0x38] sm:$0xff]   ;;  %v1512_v7 = vld [vmem:[%s1604_s8 + $0x8] sm:$0xff]   ;;  %v1513_v8 = vld [vmem:[%s1604_s8] sm:$0xff]  }
 0x107   : > { %v845_v33 = vld [vmem:[%s1955_s6 + $0x10] sm:$0xff]  ;;  %v843_v35 = vld [vmem:[%s1955_s6] sm:$0xff]  ;;  %v846_v38 = vld [vmem:[%s1955_s6 + $0x18] sm:$0xff] }
 0x108   : > { %1405 = vmatpush3.bf16.msra.mxu1 %v1507_v57  ;;  %v844_v41 = vld [vmem:[%s1955_s6 + $0x8] sm:$0xff]  ;;  %v849_v44 = vld [vmem:[%s1955_s6 + $0x30] sm:$0xff]  ;;  %v847_v47 = vld [vmem:[%s1955_s6 + $0x20] sm:$0xff] }
 0x109   : > { %1375 = vmatpush3.bf16.msra.mxu0 %v1492_v51  ;;  %1406 = vmatprep.subr.bf16.mxu1 %v1508_v59  ;;  %v850_v50 = vld [vmem:[%s1955_s6 + $0x38] sm:$0xff]  ;;  %v848_v53 = vld [vmem:[%s1955_s6 + $0x28] sm:$0xff]  ;;  %v853_v56 = vld [vmem:[%s1955_s6 + $0x50] sm:$0xff] }
 0x10a   : > { %1376 = vmatprep.subr.bf16.mxu0 %v1493_v52 }
 0x10c   : > { %1407 = vmatpush3.bf16.msra.mxu1 %v1508_v59  ;;  %v851_v59 = vld [vmem:[%s1955_s6 + $0x40] sm:$0xff] }
 0x10d   : > { %1377 = vmatpush3.bf16.msra.mxu0 %v1493_v52  ;;  %1408 = vmatprep.subr.bf16.mxu1 %v1509_v61 }
 0x10e   : > { %1378 = vmatprep.subr.bf16.mxu0 %v1494_v54 }
 0x110   : > { %1409 = vmatpush3.bf16.msra.mxu1 %v1509_v61 }
 0x111   : > { %1379 = vmatpush3.bf16.msra.mxu0 %v1494_v54  ;;  %1410 = vmatprep.subr.bf16.mxu1 %v1510_v62 }
 0x112   : > { %1380 = vmatprep.subr.bf16.mxu0 %v1495_v55 }
 0x114   : > { %1411 = vmatpush3.bf16.msra.mxu1 %v1510_v62  ;;  %v854_v62 = vld [vmem:[%s1955_s6 + $0x58] sm:$0xff] }
 0x115   : > { %1381 = vmatpush3.bf16.msra.mxu0 %v1495_v55  ;;  %1412 = vmatprep.subr.bf16.mxu1 %v1511_v1 }
 0x116   : > { %1382 = vmatprep.subr.bf16.mxu0 %v1496_v58 }
 0x118   : > { %1413 = vmatpush3.bf16.msra.mxu1 %v1511_v1  ;;  %v852_v1 = vld [vmem:[%s1955_s6 + $0x48] sm:$0xff] }
 0x119   : > { %1383 = vmatpush3.bf16.msra.mxu0 %v1496_v58  ;;  %1414 = vmatprep.subr.bf16.mxu1 %v1512_v7 }
 0x11a   : > { %1384 = vmatprep.subr.bf16.mxu0 %v1497_v60 }
 0x11c   : > { %1415 = vmatpush3.bf16.msra.mxu1 %v1512_v7  ;;  %v855_v7 = vld [vmem:[%s1955_s6 + $0x60] sm:$0xff] }
 0x11d   : > { %1385 = vmatpush3.bf16.msra.mxu0 %v1497_v60  ;;  %1416 = vmatprep.subr.bf16.mxu1 %v1513_v8 }
 0x120   : > { %1387 = vmatmul.mubr.bf16.vlgmr.msra.gmra.mxu0 %v1499_v63  ;;  %1417 = vmatpush3.bf16.msra.mxu1 %v1513_v8 }
 0x121   : > { %1390 = vmatprep.mubr.bf16.mxu0 %v1500_v0 }
 0x128   : > { %1391 = vmatmul.mubr.bf16.gmra.mxu0 %v1501_v2 }
 0x129   : > { %1394 = vmatprep.mubr.bf16.mxu0 %v1502_v3 }
 0x130   : > { %1395 = vmatmul.mubr.bf16.gmra.mxu0 %v1503_v4  ;;  %v857_v4 = vld [vmem:[%s1955_s6 + $0x70] sm:$0xff] }
 0x131   : > { %1398 = vmatprep.mubr.bf16.mxu0 %v1504_v5 }
 0x138   : > { %1399 = vmatmul.mubr.bf16.gmra.mxu0 %v1505_v6 }
 0x1e0   : > { %v1388_v9 = vpop.f32.mrf.mxu0 }
 0x1e2   : > { %v780_v10 = vpop.f32.mrf.mxu0 }
 0x1e4   : > { %v1389_v11 = vpop.f32.mrf.mxu0 }
 0x1e5   : > { %v860_v14 = vpack.c.bf16 %v1389_v11, %v1388_v9 }
 0x1e6   : > { %v783_v12 = vpop.f32.mrf.mxu0 }
 0x1e7   : > { %v859_v13 = vpack.c.bf16 %v783_v12, %v780_v10  ;;  %v858_v10 = vld [vmem:[%s1955_s6 + $0x78] sm:$0xff] }
 0x1e8   : > { %v1392_v15 = vpop.f32.mrf.mxu0 }
 0x1e9   : > { %1418 = vmatprep.mubr.bf16.mxu1 %v859_v13  ;;  %v856_v13 = vld [vmem:[%s1955_s6 + $0x68] sm:$0xff] }
 0x1ea   : > { %v796_v16 = vpop.f32.mrf.mxu0  ;;  %1419 = vmatmul.mubr.bf16.vlgmr.msra.gmra.mxu1 %v860_v14 }
 0x1ec   : > { %v1393_v17 = vpop.f32.mrf.mxu0 }
 0x1ed   : > { %v862_v20 = vpack.c.bf16 %v1393_v17, %v1392_v15 }
 0x1ee   : > { %v799_v18 = vpop.f32.mrf.mxu0 }
 0x1ef   : > { %v861_v19 = vpack.c.bf16 %v799_v18, %v796_v16 }
 0x1f0   : > { %v1396_v21 = vpop.f32.mrf.mxu0 }
 0x1f1   : > { %1422 = vmatprep.mubr.bf16.mxu1 %v861_v19 }
 0x1f2   : > { %v812_v22 = vpop.f32.mrf.mxu0  ;;  %1423 = vmatmul.mubr.bf16.gmra.mxu1 %v862_v20 }
 0x1f4   : > { %v1397_v23 = vpop.f32.mrf.mxu0 }
 0x1f5   : > { %v864_v26 = vpack.c.bf16 %v1397_v23, %v1396_v21 }
 0x1f6   : > { %v815_v24 = vpop.f32.mrf.mxu0 }
 0x1f7   : > { %v863_v25 = vpack.c.bf16 %v815_v24, %v812_v22 }
 0x1f8   : > { %v1400_v27 = vpop.f32.mrf.mxu0 }
 0x1f9   : > { %1426 = vmatprep.mubr.bf16.mxu1 %v863_v25 }
 0x1fa   : > { %v828_v28 = vpop.f32.mrf.mxu0  ;;  %1427 = vmatmul.mubr.bf16.gmra.mxu1 %v864_v26 }
 0x1fc   : > { %v1401_v29 = vpop.f32.mrf.mxu0 }
 0x1fd   : > { %v866_v32 = vpack.c.bf16 %v1401_v29, %v1400_v27 }
 0x1fe   : > { %v831_v30 = vpop.f32.mrf.mxu0 }
 0x1ff   : > { %v865_v31 = vpack.c.bf16 %v831_v30, %v828_v28 }
 0x201   : > { %1430 = vmatprep.mubr.bf16.mxu1 %v865_v31 }
 0x202   : > { %1431 = vmatmul.mubr.bf16.gmra.mxu1 %v866_v32 }
 0x2aa   : > { %v1420_v34 = vpop.f32.mrf.mxu1 }
 0x2ab   : > { %v1030_v36 = vadd.f32 %v1420_v34, %v845_v33 }
 0x2ac   : > { %v965_v37 = vpop.f32.mrf.mxu1 }
 0x2ad   : > { %1046 = vst [vmem:[%s1955_s6 + $0x10] sm:$0xff] %v1030_v36  ;;  %v1028_v39 = vadd.f32 %v965_v37, %v843_v35 }
 0x2ae   : > { %v1421_v40 = vpop.f32.mrf.mxu1 }
 0x2af   : > { %1044 = vst [vmem:[%s1955_s6] sm:$0xff] %v1028_v39  ;;  %v1031_v42 = vadd.f32 %v1421_v40, %v846_v38 }
 0x2b0   : > { %v968_v43 = vpop.f32.mrf.mxu1 }
 0x2b1   : > { %1047 = vst [vmem:[%s1955_s6 + $0x18] sm:$0xff] %v1031_v42  ;;  %v1029_v45 = vadd.f32 %v968_v43, %v844_v41 }
 0x2b2   : > { %v1424_v46 = vpop.f32.mrf.mxu1 }
 0x2b3   : > { %1045 = vst [vmem:[%s1955_s6 + $0x8] sm:$0xff] %v1029_v45  ;;  %v1034_v48 = vadd.f32 %v1424_v46, %v849_v44 }
 0x2b4   : > { %v981_v49 = vpop.f32.mrf.mxu1  ;;  %v1067_v19 = vld [vmem:[%s1955_s6 + $0x10] sm:$0xff] (%p1060_p6) }
 0x2b5   : > { %1050 = vst [vmem:[%s1955_s6 + $0x30] sm:$0xff] %v1034_v48  ;;  %v1032_v51 = vadd.f32 %v981_v49, %v847_v47  ;;  %v1083_v22 = vmax.f32 (%p1060_p6), %v1067_v19, 0.0 }
 0x2b6   : > { %v1425_v52 = vpop.f32.mrf.mxu1  ;;  %v1065_v17 = vld [vmem:[%s1955_s6] sm:$0xff] (%p1060_p6) }
 0x2b7   : > { %1048 = vst [vmem:[%s1955_s6 + $0x20] sm:$0xff] %v1032_v51  ;;  %v1035_v54 = vadd.f32 %v1425_v52, %v850_v50  ;;  %v1081_v20 = vmax.f32 (%p1060_p6), %v1065_v17, 0.0  ;;  %1099 = vst [vmem:[%s1955_s6 + $0x10] sm:$0xff] (%p1060_p6), %v1083_v22 }
 0x2b8   : > { %v984_v55 = vpop.f32.mrf.mxu1  ;;  %v1068_v23 = vld [vmem:[%s1955_s6 + $0x18] sm:$0xff] (%p1060_p6) }
 0x2b9   : > { %1051 = vst [vmem:[%s1955_s6 + $0x38] sm:$0xff] %v1035_v54  ;;  %v1033_v57 = vadd.f32 %v984_v55, %v848_v53  ;;  %v1084_v26 = vmax.f32 (%p1060_p6), %v1068_v23, 0.0  ;;  %1097 = vst [vmem:[%s1955_s6] sm:$0xff] (%p1060_p6), %v1081_v20 }
 0x2ba   : > { %v1428_v58 = vpop.f32.mrf.mxu1  ;;  %v1066_v18 = vld [vmem:[%s1955_s6 + $0x8] sm:$0xff] (%p1060_p6) }
 0x2bb   : > { %1049 = vst [vmem:[%s1955_s6 + $0x28] sm:$0xff] %v1033_v57  ;;  %v1038_v60 = vadd.f32 %v1428_v58, %v853_v56  ;;  %v1082_v21 = vmax.f32 (%p1060_p6), %v1066_v18, 0.0  ;;  %1100 = vst [vmem:[%s1955_s6 + $0x18] sm:$0xff] (%p1060_p6), %v1084_v26 }
 0x2bc   : > { %v997_v61 = vpop.f32.mrf.mxu1  ;;  %v1071_v29 = vld [vmem:[%s1955_s6 + $0x30] sm:$0xff] (%p1060_p6) }
 0x2bd   : > { %1054 = vst [vmem:[%s1955_s6 + $0x50] sm:$0xff] %v1038_v60  ;;  %v1036_v63 = vadd.f32 %v997_v61, %v851_v59  ;;  %1098 = vst [vmem:[%s1955_s6 + $0x8] sm:$0xff] (%p1060_p6), %v1082_v21  ;;  %v1087_v32 = vmax.f32 (%p1060_p6), %v1071_v29, 0.0 }
 0x2be   : > { %v1429_v0 = vpop.f32.mrf.mxu1  ;;  %v1069_v24 = vld [vmem:[%s1955_s6 + $0x20] sm:$0xff] (%p1060_p6) }
 0x2bf   : > { %1052 = vst [vmem:[%s1955_s6 + $0x40] sm:$0xff] %v1036_v63  ;;  %v1039_v2 = vadd.f32 %v1429_v0, %v854_v62  ;;  %v1085_v27 = vmax.f32 (%p1060_p6), %v1069_v24, 0.0  ;;  %1103 = vst [vmem:[%s1955_s6 + $0x30] sm:$0xff] (%p1060_p6), %v1087_v32 }
 0x2c0   : > { %v1000_v3 = vpop.f32.mrf.mxu1  ;;  %v1072_v30 = vld [vmem:[%s1955_s6 + $0x38] sm:$0xff] (%p1060_p6) }
 0x2c1   : > { %1055 = vst [vmem:[%s1955_s6 + $0x58] sm:$0xff] %v1039_v2  ;;  %v1037_v5 = vadd.f32 %v1000_v3, %v852_v1  ;;  %v1088_v33 = vmax.f32 (%p1060_p6), %v1072_v30, 0.0  ;;  %1101 = vst [vmem:[%s1955_s6 + $0x20] sm:$0xff] (%p1060_p6), %v1085_v27 }
 0x2c2   : > { %v1432_v6 = vpop.f32.mrf.mxu1  ;;  %v1070_v25 = vld [vmem:[%s1955_s6 + $0x28] sm:$0xff] (%p1060_p6) }
 0x2c3   : > { %1053 = vst [vmem:[%s1955_s6 + $0x48] sm:$0xff] %v1037_v5  ;;  %v1042_v8 = vadd.f32 %v1432_v6, %v857_v4  ;;  %v1086_v28 = vmax.f32 (%p1060_p6), %v1070_v25, 0.0  ;;  %1104 = vst [vmem:[%s1955_s6 + $0x38] sm:$0xff] (%p1060_p6), %v1088_v33 }
 0x2c4   : > { %v1013_v9 = vpop.f32.mrf.mxu1  ;;  %v1075_v36 = vld [vmem:[%s1955_s6 + $0x50] sm:$0xff] (%p1060_p6) }
 0x2c5   : > { %1058 = vst [vmem:[%s1955_s6 + $0x70] sm:$0xff] %v1042_v8  ;;  %v1040_v11 = vadd.f32 %v1013_v9, %v855_v7  ;;  %1102 = vst [vmem:[%s1955_s6 + $0x28] sm:$0xff] (%p1060_p6), %v1086_v28  ;;  %v1091_v39 = vmax.f32 (%p1060_p6), %v1075_v36, 0.0 }
 0x2c6   : > { %v1433_v12 = vpop.f32.mrf.mxu1  ;;  %v1073_v31 = vld [vmem:[%s1955_s6 + $0x40] sm:$0xff] (%p1060_p6) }
 0x2c7   : > { %1056 = vst [vmem:[%s1955_s6 + $0x60] sm:$0xff] %v1040_v11  ;;  %v1043_v14 = vadd.f32 %v1433_v12, %v858_v10  ;;  %1064 = sbr.rel (!%p1060_p6) target bundleno = 726 (0x2d6), region = 52  ;;  %v1089_v34 = vmax.f32 (%p1060_p6), %v1073_v31, 0.0  ;;  %1107 = vst [vmem:[%s1955_s6 + $0x50] sm:$0xff] (%p1060_p6), %v1091_v39 }
 0x2c8   : > { %v1016_v15 = vpop.f32.mrf.mxu1  ;;  %v1076_v37 = vld [vmem:[%s1955_s6 + $0x58] sm:$0xff] (%p1060_p6) }
 0x2c9   : > { %1059 = vst [vmem:[%s1955_s6 + $0x78] sm:$0xff] %v1043_v14  ;;  %v1041_v16 = vadd.f32 %v1016_v15, %v856_v13  ;;  %v1092_v40 = vmax.f32 (%p1060_p6), %v1076_v37, 0.0  ;;  %1105 = vst [vmem:[%s1955_s6 + $0x40] sm:$0xff] (%p1060_p6), %v1089_v34 }
 0x2ca   : > { %v1074_v35 = vld [vmem:[%s1955_s6 + $0x48] sm:$0xff] (%p1060_p6) }
 0x2cb   : > { %1057 = vst [vmem:[%s1955_s6 + $0x68] sm:$0xff] %v1041_v16  ;;  %v1090_v38 = vmax.f32 (%p1060_p6), %v1074_v35, 0.0  ;;  %1108 = vst [vmem:[%s1955_s6 + $0x58] sm:$0xff] (%p1060_p6), %v1092_v40 }
 0x2cc   : > { %v1079_v43 = vld [vmem:[%s1955_s6 + $0x70] sm:$0xff] }
 0x2cd   : > { %v1095_v46 = vmax.f32 %v1079_v43, 0.0  ;;  %1106 = vst [vmem:[%s1955_s6 + $0x48] sm:$0xff] %v1090_v38 }
 0x2ce   : > { %v1077_v41 = vld [vmem:[%s1955_s6 + $0x60] sm:$0xff] }
 0x2cf   : > { %v1093_v44 = vmax.f32 %v1077_v41, 0.0  ;;  %1111 = vst [vmem:[%s1955_s6 + $0x70] sm:$0xff] %v1095_v46 }
 0x2d0   : > { %v1080_v47 = vld [vmem:[%s1955_s6 + $0x78] sm:$0xff] }
 0x2d1   : > { %v1096_v48 = vmax.f32 %v1080_v47, 0.0  ;;  %1109 = vst [vmem:[%s1955_s6 + $0x60] sm:$0xff] %v1093_v44 }
 0x2d2   : > { %v1078_v42 = vld [vmem:[%s1955_s6 + $0x68] sm:$0xff] }
 0x2d3   : > { %v1094_v45 = vmax.f32 %v1078_v42, 0.0  ;;  %1112 = vst [vmem:[%s1955_s6 + $0x78] sm:$0xff] %v1096_v48 }
 0x2d5   : > { %1110 = vst [vmem:[%s1955_s6 + $0x68] sm:$0xff] %v1094_v45 }
 0x2d6 PF: > { %s16_s23 = sadd.s32 1, %s1536_s23   ;;  %s1956_s21 = smov %s1532_s22 }
 0x2d7   : > { %p13_p7 = scmp.ge.s32.totalorder %s16_s23, 5   ;;  %s1957_s22 = smov %s1959_s24 }
 0x2d9   :  { %15 = sbr.rel (!%p13_p7) target bundleno = 2 (0x2), region = 91 }

</bundles_post_ra>
